<compile_context>
chip_gen: v7x
topology: tpu7x:2x2x1
jax: 0.10.0
libtpu: 0.0.40
codegen_flags: <defaults>
</compile_context>

<pallas_src>
import functools

import numpy as np
import jax
import jax.numpy as jnp
from jax.experimental import pallas as pl
from jax.experimental.pallas import tpu as pltpu

_LANE = 128


def _round_up(x, m):
    return ((x + m - 1) // m) * m


def _cdiv(a, b):
    return -(-a // b)


def _sublane_pack(itemsize):
    # Sublane packing factor: f32 -> 8, bf16 -> 16, int8/fp8 -> 32.
    return {4: 8, 2: 16, 1: 32}.get(int(itemsize), 8)


# ----------------------------------------------------------------------------
# Kernel
# ----------------------------------------------------------------------------
def _irrep_dropout_kernel(x_ref, s_ref, o_ref, *, irrep_dims):
    """One (TB, D, TC) tile: expand per-irrep scale over its rows, fused mul."""
    tb, _, tc = s_ref.shape                      # (TB, K, TC)
    s = s_ref[...]                               # f32, values in {0, 1/(1-p)}
    # Static, unrolled expansion K -> D: each irrep's single row broadcast to
    # its d_k rows, then one concatenate along the irreps (sublane) axis.
    parts = [jnp.broadcast_to(s[:, k:k + 1, :], (tb, d_k, tc))
             for k, d_k in enumerate(irrep_dims)]
    mask = parts[0] if len(parts) == 1 else jnp.concatenate(parts, axis=1)
    # Single fused multiply, one full-tile lane-dense (unmasked) store.
    o_ref[...] = (x_ref[...] * mask).astype(o_ref.dtype)


# ----------------------------------------------------------------------------
# Mask / scale generation (wrapper side)
# ----------------------------------------------------------------------------
def _make_irrep_scale(key, batch, num_irreps, channels, p):
    """One Bernoulli(1-p) draw per (batch, irrep, channel), scaled by 1/(1-p).

    Kept in f32 so 1/(1-p) is exact (no bf16 rounding of the scale).
    Requires p < 1.0 (p >= 1.0 is handled by the caller).
    """
    u = jax.random.uniform(key, (batch, num_irreps, channels), dtype=jnp.float32)
    keep = (u >= jnp.float32(p)).astype(jnp.float32)       # P(keep) = 1 - p
    return keep * jnp.float32(1.0 / (1.0 - p))


# ----------------------------------------------------------------------------
# Tile picking
# ----------------------------------------------------------------------------
def _vmem_capacity_bytes():
    try:
        info = pltpu.get_tpu_info()
        return int(getattr(info, "vmem_capacity_bytes", 64 << 20))
    except Exception:
        return 64 << 20  # conservative: v7x per-TensorCore VMEM


def _block_live_bytes(tb, tc, d, k, itemsize):
    """Estimate of live VMEM for one pipelined block (both buffers)."""
    d_pad = _round_up(d, _sublane_pack(itemsize))
    k_pad = _round_up(k, _sublane_pack(4))
    x_blk = tb * d_pad * tc * itemsize            # one x (or out) block
    s_blk = tb * k_pad * tc * 4                   # one scale block (f32)
    tmp = 2 * tb * _round_up(d, 8) * tc * 4       # expanded mask + product (f32)
    return 2 * x_blk + 2 * x_blk + 2 * s_blk + tmp


def _pick_tiles(batch, d, k, channels_padded, itemsize, budget):
    # Channel tile: prefer the full (padded) channel axis -> contiguous slab
    # per block; fall back to smaller multiples of 128 only if even TB=1 would
    # blow the budget.
    cand = [channels_padded] + [c for c in (2048, 1024, 512, 256, 128)
                                if c < channels_padded and channels_padded % c == 0]
    tc = cand[-1]
    for c in cand:
        if _block_live_bytes(1, c, d, k, itemsize) <= budget:
            tc = c
            break
    # Batch tile: biggest TB (<= batch) whose live-VMEM estimate fits.
    per_tb = max(_block_live_bytes(1, tc, d, k, itemsize), 1)
    tb = max(1, min(batch, budget // per_tb))
    return tb, tc


def _ensure_multi_step(batch, channels_padded, tb, tc, min_steps=2):
    """Keep >= min_steps grid steps so both v7x TensorCores get work."""
    def steps(tb_, tc_):
        return _cdiv(batch, tb_) * (channels_padded // tc_)

    while steps(tb, tc) < min_steps:
        if tb > 1:
            tb = (tb + 1) // 2
        else:
            smaller = [c for c in (tc // 2, 1024, 512, 256, 128)
                       if 128 <= c < tc and c % 128 == 0
                       and channels_padded % c == 0]
            if not smaller:
                break
            tc = max(smaller)
    return tb, tc


# ----------------------------------------------------------------------------
# Public wrapper
# ----------------------------------------------------------------------------
def separable_irrep_wise_dropout(x, key, *, irrep_dims, p,
                                 training=True, work_on_eval=False,
                                 use_pallas=None):
    """JAX/Pallas equivalent of RefSeparableIrrepWiseDropout.forward."""
    apply_dropout = work_on_eval or training
    if (not apply_dropout) or p == 0.0:
        return x
    if p >= 1.0:
        # F.dropout(p=1) zeroes everything; avoids 0 * inf = NaN.
        return jnp.zeros_like(x)

    B, D, C = x.shape
    irrep_dims = tuple(int(d) for d in irrep_dims)
    assert D == sum(irrep_dims), "dim -2 must equal the sum of irrep dims"
    K = len(irrep_dims)
    itemsize = jnp.dtype(x.dtype).itemsize

    scale = _make_irrep_scale(key, B, K, C, float(p))       # (B, K, C) f32

    if use_pallas is None:
        # For sub-VMEM-sized inputs the launch/grid overhead exceeds the copy
        # time; use the fused XLA expression instead.
        use_pallas = (B * D * C * itemsize) >= (1 << 20)
    if not use_pallas:
        mask = jnp.repeat(scale, np.asarray(irrep_dims), axis=1,
                          total_repeat_length=D)
        return (x * mask).astype(x.dtype)

    # Lane-dense layout: pad channels to a multiple of 128 so every store is
    # an unmasked full-lane vst; slice the padding off afterwards.
    Cp = _round_up(C, _LANE)
    x_in = x if Cp == C else jnp.pad(x, ((0, 0), (0, 0), (0, Cp - C)))
    s_in = scale if Cp == C else jnp.pad(scale, ((0, 0), (0, 0), (0, Cp - C)))

    capacity = _vmem_capacity_bytes()
    budget = min(capacity // 2, 48 << 20)        # headroom for the compiler
    TB, TC = _pick_tiles(B, D, K, Cp, itemsize, budget)
    TB, TC = _ensure_multi_step(B, Cp, TB, TC, min_steps=2)
    grid = (_cdiv(B, TB), Cp // TC)

    live = _block_live_bytes(TB, TC, D, K, itemsize)
    vmem_limit = int(min(capacity, max(2 * live + (8 << 20), 32 << 20)))

    kernel = functools.partial(_irrep_dropout_kernel, irrep_dims=irrep_dims)

    out = pl.pallas_call(
        kernel,
        out_shape=jax.ShapeDtypeStruct((B, D, Cp), x.dtype),
        grid=grid,
        in_specs=[
            # x: tiled over batch and channels, full irreps axis D per block.
            pl.BlockSpec((TB, D, TC), lambda i, j: (i, 0, j)),
            # per-irrep scale: same batch/channel tiling, full K per block.
            pl.BlockSpec((TB, K, TC), lambda i, j: (i, 0, j)),
        ],
        out_specs=pl.BlockSpec((TB, D, TC), lambda i, j: (i, 0, j)),
        compiler_params=pltpu.CompilerParams(
            dimension_semantics=("parallel", "parallel"),
            vmem_limit_bytes=vmem_limit),
        cost_estimate=pl.CostEstimate(
            flops=B * D * Cp,
            transcendentals=0,
            bytes_accessed=2 * B * D * Cp * itemsize + B * K * Cp * 4),
    )(x_in, s_in)

    return out if Cp == C else out[:, :, :C]


# ----------------------------------------------------------------------------
# Self-test
# ----------------------------------------------------------------------------
if __name__ == "__main__":
    # Irreps "0e + 1o + 2e" -> per-irrep dims (1, 3, 5), total D = 9.
    irrep_dims = (1, 3, 5)
    D = sum(irrep_dims)
    p = 0.5
    root = jax.random.PRNGKey(0)

    # --- Case 1: lane-aligned channels, exercises the main Pallas path ------
    B, C = 4, 384                       # Cp = 384, grid forced to >= 2 steps
    kx, kmask, kx2, kmask2 = jax.random.split(root, 4)
    x = jax.random.normal(kx, (B, D, C), dtype=jnp.float32)

    y = separable_irrep_wise_dropout(
        x, kmask, irrep_dims=irrep_dims, p=p,
        training=True, work_on_eval=False, use_pallas=True)
    y = jax.block_until_ready(y)

    scale_small = _make_irrep_scale(kmask, B, len(irrep_dims), C, p)
    scale_full = jnp.repeat(scale_small, np.asarray(irrep_dims), axis=1,
                            total_repeat_length=D)
    y_ref = (x * scale_full).astype(x.dtype)
    np.testing.assert_allclose(np.asarray(y), np.asarray(y_ref),
                               rtol=1e-6, atol=1e-7)

    # dropout1d invariant: within each irrep the mask is shared across rows.
    xn, yn, sn = np.asarray(x), np.asarray(y), np.asarray(scale_small)
    start = 0
    for k, d_k in enumerate(irrep_dims):
        expect = xn[:, start:start + d_k, :] * sn[:, k:k + 1, :]
        np.testing.assert_allclose(yn[:, start:start + d_k, :], expect,
                                   rtol=1e-6, atol=1e-7)
        start += d_k

    # --- Case 2: ragged batch + channel padding path -------------------------
    B2, C2 = 3, 200                     # Cp = 256, cdiv grid along batch
    x2 = jax.random.normal(kx2, (B2, D, C2), dtype=jnp.float32)
    y2 = jax.block_until_ready(separable_irrep_wise_dropout(
        x2, kmask2, irrep_dims=irrep_dims, p=p,
        training=True, work_on_eval=False, use_pallas=True))
    s2 = _make_irrep_scale(kmask2, B2, len(irrep_dims), C2, p)
    y2_ref = (x2 * jnp.repeat(s2, np.asarray(irrep_dims), axis=1,
                              total_repeat_length=D)).astype(x2.dtype)
    np.testing.assert_allclose(np.asarray(y2), np.asarray(y2_ref),
                               rtol=1e-6, atol=1e-7)

    # --- Pass-through / edge-case paths --------------------------------------
    y_eval = separable_irrep_wise_dropout(
        x, kmask, irrep_dims=irrep_dims, p=p, training=False, work_on_eval=False)
    np.testing.assert_array_equal(np.asarray(y_eval), xn)

    y_p0 = separable_irrep_wise_dropout(
        x, kmask, irrep_dims=irrep_dims, p=0.0, training=True, work_on_eval=False)
    np.testing.assert_array_equal(np.asarray(y_p0), xn)

    y_p1 = separable_irrep_wise_dropout(
        x, kmask, irrep_dims=irrep_dims, p=1.0, training=True, work_on_eval=False)
    np.testing.assert_array_equal(np.asarray(y_p1), np.zeros_like(xn))

    print("KERNEL_OK")
</pallas_src>

<mosaic_0001>
module attributes {stable_mosaic.version = 11 : i64} {
  func.func @_irrep_dropout_kernel(%arg0: i32, %arg1: i32, %arg2: memref<2x9x384xf32, #tpu.memory_space<vmem>>, %arg3: memref<2x3x384xf32, #tpu.memory_space<vmem>>, %arg4: memref<2x9x384xf32, #tpu.memory_space<vmem>>) attributes {dimension_semantics = [#tpu.dimension_semantics<parallel>, #tpu.dimension_semantics<parallel>], iteration_bounds = array<i64: 2, 1>, scalar_prefetch = 0 : i64, scratch_operands = 0 : i64, tpu.core_type = #tpu.core_type<tc>, window_params = [{transform_indices = @transform_0, window_bounds = array<i64: 2, 9, 384>}, {transform_indices = @transform_1, window_bounds = array<i64: 2, 3, 384>}, {transform_indices = @transform_2, window_bounds = array<i64: 2, 9, 384>}]} {
    %c0 = arith.constant 0 : index
    %c0_0 = arith.constant 0 : index
    %c0_1 = arith.constant 0 : index
    %0 = vector.load %arg3[%c0, %c0_0, %c0_1] : memref<2x3x384xf32, #tpu.memory_space<vmem>>, vector<2x3x384xf32>
    %1 = vector.extract_strided_slice %0 {offsets = [0, 0, 0], sizes = [2, 1, 384], strides = [1, 1, 1]} : vector<2x3x384xf32> to vector<2x1x384xf32>
    %2 = vector.extract_strided_slice %0 {offsets = [0, 1, 0], sizes = [2, 1, 384], strides = [1, 1, 1]} : vector<2x3x384xf32> to vector<2x1x384xf32>
    %3 = vector.shape_cast %2 : vector<2x1x384xf32> to vector<2x1x384xf32>
    %4 = vector.broadcast %3 : vector<2x1x384xf32> to vector<2x3x384xf32>
    %5 = vector.extract_strided_slice %0 {offsets = [0, 2, 0], sizes = [2, 1, 384], strides = [1, 1, 1]} : vector<2x3x384xf32> to vector<2x1x384xf32>
    %6 = vector.shape_cast %5 : vector<2x1x384xf32> to vector<2x1x384xf32>
    %7 = vector.broadcast %6 : vector<2x1x384xf32> to vector<2x5x384xf32>
    %8 = tpu.concatenate %1, %4, %7 in 1 : vector<2x1x384xf32>, vector<2x3x384xf32>, vector<2x5x384xf32> -> vector<2x9x384xf32>
    %c0_2 = arith.constant 0 : index
    %c0_3 = arith.constant 0 : index
    %c0_4 = arith.constant 0 : index
    %9 = vector.load %arg2[%c0_2, %c0_3, %c0_4] : memref<2x9x384xf32, #tpu.memory_space<vmem>>, vector<2x9x384xf32>
    %10 = arith.mulf %9, %8 : vector<2x9x384xf32>
    %c0_5 = arith.constant 0 : index
    %c0_6 = arith.constant 0 : index
    %c0_7 = arith.constant 0 : index
    %11 = vector.load %arg4[%c0_5, %c0_6, %c0_7] : memref<2x9x384xf32, #tpu.memory_space<vmem>>, vector<2x9x384xf32>
    tpu.vector_store %arg4[%c0_5, %c0_6, %c0_7], %10 {strides = array<i32>} : memref<2x9x384xf32, #tpu.memory_space<vmem>>, vector<2x9x384xf32>,
    return
  }
  func.func @transform_0(%arg0: i32, %arg1: i32) -> (i32, i32, i32) {
    %c0_i32 = arith.constant 0 : i32
    %c0_i32_0 = arith.constant 0 : i32
    return %arg0, %c0_i32, %arg1 : i32, i32, i32
  }
  func.func @transform_1(%arg0: i32, %arg1: i32) -> (i32, i32, i32) {
    %c0_i32 = arith.constant 0 : i32
    %c0_i32_0 = arith.constant 0 : i32
    return %arg0, %c0_i32, %arg1 : i32, i32, i32
  }
  func.func @transform_2(%arg0: i32, %arg1: i32) -> (i32, i32, i32) {
    %c0_i32 = arith.constant 0 : i32
    %c0_i32_0 = arith.constant 0 : i32
    return %arg0, %c0_i32, %arg1 : i32, i32, i32
  }
}

</mosaic_0001>

<bundles_post_ra>
// kernel: tpu_custom_call.1
= control target key start
LH: loop header
LB: loop body
LE: loop exit
PB: predicated region body
PF: predicated region fallthrough
CT: control target
= control target key end

     0   :  { %s614_s9 = smov 0   ;;  %s616_s10 = smov 0   ;;  %s742_s0 = inlined_call_operand.vmem [shape: f32[4,9,384], index: 0, kind: input, shape index: {}]   ;;  %s743_s1 = inlined_call_operand.vmem [shape: f32[4,3,384], index: 1, kind: input, shape index: {}]   ;;  %s744_s2 = inlined_call_operand.vmem [shape: f32[4,9,384], index: 2, kind: output, shape index: {}]  }
   0x1   :  { %s618_s11 = smov 0  }
   0x2 LB: > { %s24_s12 = sadd.s32 1, %s593_s10  ;;  %p540_p0 = scmp.ge.s32.totalorder %s597_s11, 1  ;;  %s597_s11 = sphi %s618_s11, %s12_s11   ;;  %s593_s10 = sphi %s616_s10, %s746_s10   ;;  %s589_s9 = sphi %s614_s9, %s745_s9  }
   0x3   : > { %p26_p1 = scmp.ge.s32.totalorder %s24_s12, 2  ;;  %p154_p2 = scmp.lt.s32.totalorder %s597_s11, 3 }
   0x5   : > { %s748_s12 = smov (%p26_p1, %s24_s12), 0  ;;  %p155_p3 = pnand %p540_p0, %p154_p2 }
   0x6   : > { %s541_s13 = sshll.u32 (!%p155_p3), %s589_s9, 1  ;;  %v240_v0 = vlaneseq (!%p155_p3)  ;;  %vm378_vm0 = vcmask (!%p155_p3), 1040384   ;;  %vm385_vm1 = vcmask (!%p155_p3), 1043456  }
   0x7   : > { %158 = sbr.rel (%p155_p3) target bundleno = 38 (0x26), region = 28  ;;  %p198_p4 = scmp.lt.s32.totalorder (!%p155_p3), %s541_s13, 3 }
   0x8   : > { %v632_v1 = vshrl.u32 (!%p155_p3), %v240_v0, 7 }
   0xa   : > { %v639_v2 = vsub.s32 (!%p155_p3), 1, %v632_v1  ;;  %v642_v3 = vsub.s32 (!%p155_p3), 2, %v632_v1  ;;  %v645_v4 = vsub.s32 (!%p155_p3), 0, %v632_v1  ;;  %v246_v5 = vsub.s32 (!%p155_p3), 5, %v632_v1 }
   0xb   : > { %v300_v6 = vsub.s32 (!%p155_p3), 6, %v632_v1  ;;  %v354_v7 = vsub.s32 (!%p155_p3), 4, %v632_v1 }
   0xe   : > { %s750_s13 = smov (!%p198_p4, %s541_s13), 3 }
   0xf   : > { %s549_s14 = smul.u32 48, %s750_s13 }
  0x10   : > { %s550_s15 = smul.u32 12, %s750_s13 }
  0x11   : > { %s655_s18 = scalar_lea.vmem %s742_s0, %s549_s14  ;;  %s681_s24 = scalar_lea.vmem %s744_s2, %s549_s14 }
  0x12   : > { %s660_s21 = scalar_lea.vmem %s743_s1, %s550_s15  ;;  %v395_v19 = vld [vmem:[%s655_s18 + $0x18] sm:$0x1]  ;;  %v396_v24 = vld [vmem:[%s655_s18 + $0x20] sm:$0x1]  ;;  %v393_v27 = vld [vmem:[%s655_s18 + $0x8] sm:$0xff] }
  0x13   : > { %v232_v8 = vld [vmem:[%s660_s21] sm:$0x77]  ;;  %v233_v9 = vld [vmem:[%s660_s21 + $0x8] sm:$0x7]  ;;  %v234_v14 = vld [vmem:[%s660_s21 + $0xc] sm:$0x77] }
  0x14   : > { %v243_v10 = vrot.slane %v232_v8, %v639_v2  ;;  %v297_v11 = vrot.slane %v232_v8, %v642_v3  ;;  %v351_v12 = vrot.slane %v232_v8, %v645_v4  ;;  %v247_v13 = vrot.slane %v232_v8, %v246_v5  ;;  %v392_v25 = vld [vmem:[%s655_s18] sm:$0xff]  ;;  %v397_v30 = vld [vmem:[%s655_s18 + $0x28] sm:$0x1]  ;;  %v394_v34 = vld [vmem:[%s655_s18 + $0x10] sm:$0xff] }
  0x15   : > { %v301_v15 = vrot.slane %v232_v8, %v300_v6  ;;  %v355_v16 = vrot.slane %v232_v8, %v354_v7  ;;  %v251_v17 = vrot.slane %v233_v9, %v639_v2  ;;  %v305_v18 = vrot.slane %v233_v9, %v642_v3  ;;  %v235_v41 = vld [vmem:[%s660_s21 + $0x14] sm:$0x7]  ;;  %v401_v46 = vld [vmem:[%s655_s18 + $0x48] sm:$0x1]  ;;  %v402_v60 = vld [vmem:[%s655_s18 + $0x50] sm:$0x1] }
  0x16   : > { %v273_v20 = vrot.slane %v243_v10, %v639_v2  ;;  %v327_v21 = vrot.slane %v297_v11, %v642_v3  ;;  %v277_v22 = vrot.slane %v247_v13, %v639_v2  ;;  %v359_v23 = vrot.slane %v233_v9, %v645_v4  ;;  %v398_v51 = vld [vmem:[%s655_s18 + $0x30] sm:$0xff]  ;;  %v403_v1 = vld [vmem:[%s655_s18 + $0x58] sm:$0x1] }
  0x17   : > { %v331_v26 = vrot.slane %v301_v15, %v642_v3  ;;  %v281_v28 = vrot.slane %v251_v17, %v639_v2  ;;  %v335_v29 = vrot.slane %v305_v18, %v642_v3  ;;  %v255_v31 = vrot.slane %v234_v14, %v639_v2 }
  0x18   : > { %v379_v32 = vsel %vm378_vm0, %v351_v12, %v273_v20  ;;  %v380_v33 = vsel %vm378_vm0, %v355_v16, %v277_v22  ;;  %v407_v35 = vmul.f32 %v395_v19, %v327_v21  ;;  %v309_v36 = vrot.slane %v234_v14, %v642_v3 }
  0x19   : > { %v386_v37 = vsel %vm385_vm1, %v379_v32, %v327_v21  ;;  %v387_v38 = vsel %vm385_vm1, %v380_v33, %v331_v26  ;;  %v381_v39 = vsel %vm378_vm0, %v359_v23, %v281_v28  ;;  %v408_v40 = vmul.f32 %v396_v24, %v331_v26 }
  0x1a   : > { %v404_v42 = vmul.f32 %v392_v25, %v386_v37  ;;  %v405_v43 = vmul.f32 %v393_v27, %v387_v38  ;;  %v388_v44 = vsel %vm385_vm1, %v381_v39, %v335_v29  ;;  %419 = vst [vmem:[%s681_s24 + $0x18] sm:$0x1] %v407_v35  ;;  %v409_v45 = vmul.f32 %v397_v30, %v335_v29 }
  0x1b   : > { %v406_v47 = vmul.f32 %v394_v34, %v388_v44  ;;  %420 = vst [vmem:[%s681_s24 + $0x20] sm:$0x1] %v408_v40  ;;  %v285_v48 = vrot.slane %v255_v31, %v639_v2  ;;  %v339_v49 = vrot.slane %v309_v36, %v642_v3  ;;  %v363_v50 = vrot.slane %v234_v14, %v645_v4 }
  0x1c   : > { %416 = vst [vmem:[%s681_s24] sm:$0xff] %v404_v42  ;;  %417 = vst [vmem:[%s681_s24 + $0x8] sm:$0xff] %v405_v43  ;;  %v259_v52 = vrot.slane %v234_v14, %v246_v5  ;;  %v313_v53 = vrot.slane %v234_v14, %v300_v6  ;;  %v367_v54 = vrot.slane %v234_v14, %v354_v7  ;;  %v399_v6 = vld [vmem:[%s655_s18 + $0x38] sm:$0xff]  ;;  %v400_v7 = vld [vmem:[%s655_s18 + $0x40] sm:$0xff] }
  0x1d   : > { %421 = vst [vmem:[%s681_s24 + $0x28] sm:$0x1] %v409_v45  ;;  %v263_v55 = vrot.slane %v235_v41, %v639_v2  ;;  %418 = vst [vmem:[%s681_s24 + $0x10] sm:$0xff] %v406_v47  ;;  %v382_v56 = vsel %vm378_vm0, %v363_v50, %v285_v48  ;;  %v317_v57 = vrot.slane %v235_v41, %v642_v3 }
  0x1e   : > { %v371_v58 = vrot.slane %v235_v41, %v645_v4  ;;  %v413_v59 = vmul.f32 %v401_v46, %v339_v49  ;;  %v389_v61 = vsel %vm385_vm1, %v382_v56, %v339_v49  ;;  %v289_v62 = vrot.slane %v259_v52, %v639_v2 }
  0x1f   : > { %v343_v63 = vrot.slane %v313_v53, %v642_v3  ;;  %v293_v0 = vrot.slane %v263_v55, %v639_v2  ;;  %v410_v5 = vmul.f32 %v398_v51, %v389_v61  ;;  %v347_v4 = vrot.slane %v317_v57, %v642_v3 }
  0x20   : > { %425 = vst [vmem:[%s681_s24 + $0x48] sm:$0x1] %v413_v59  ;;  %v383_v8 = vsel %vm378_vm0, %v367_v54, %v289_v62 }
  0x21   : > { %v384_v9 = vsel %vm378_vm0, %v371_v58, %v293_v0  ;;  %v414_v10 = vmul.f32 %v402_v60, %v343_v63  ;;  %422 = vst [vmem:[%s681_s24 + $0x30] sm:$0xff] %v410_v5  ;;  %v390_v11 = vsel %vm385_vm1, %v383_v8, %v343_v63  ;;  %v415_v12 = vmul.f32 %v403_v1, %v347_v4 }
  0x22   : > { %v391_v2 = vsel %vm385_vm1, %v384_v9, %v347_v4  ;;  %v411_v13 = vmul.f32 %v399_v6, %v390_v11 }
  0x23   : > { %v412_v14 = vmul.f32 %v400_v7, %v391_v2  ;;  %426 = vst [vmem:[%s681_s24 + $0x50] sm:$0x1] %v414_v10  ;;  %427 = vst [vmem:[%s681_s24 + $0x58] sm:$0x1] %v415_v12 }
  0x24   : > { %423 = vst [vmem:[%s681_s24 + $0x38] sm:$0xff] %v411_v13 }
  0x25   : > { %424 = vst [vmem:[%s681_s24 + $0x40] sm:$0xff] %v412_v14 }
  0x26 PF: > { %s12_s11 = sadd.s32 1, %s597_s11   ;;  %s745_s9 = smov %s593_s10 }
  0x27   : > { %p9_p5 = scmp.ge.s32.totalorder %s12_s11, 4   ;;  %s746_s10 = smov %s748_s12 }
  0x29   :  { %11 = sbr.rel (!%p9_p5) target bundleno = 2 (0x2), region = 61 }

</bundles_post_ra>
